<compile_context>
chip_gen: v6e
topology: v6e:2x2x1
jax: 0.10.0
libtpu: 0.0.40
codegen_flags: <defaults>
</compile_context>

<pallas_src>
import functools

import numpy as np

import jax
import jax.numpy as jnp
from jax.experimental import pallas as pl
from jax.experimental.pallas import tpu as pltpu


def _aspp_kernel(x_ref, w_ref, b_ref, m_ref, o_ref, *,
                 batch_block, shifts, needs_mask):
    """Fused ASPP head for one block of `batch_block` images.

    x_ref : (batch_block, Cin, H*W)   flattened-spatial input block
    w_ref : (NL, K)                   flat fused weights (resident in VMEM)
    b_ref : (NL, 1)                   summed bias (resident)
    m_ref : (n_taps, H*W)             0/1 boundary masks per tap (resident)
    o_ref : (batch_block, NL, H*W)    output block (lane-dense, NCHW order)
    """
    w = w_ref[...]                                     # (NL, K)
    bias = b_ref[...]                                  # (NL, 1)
    masks = [m_ref[t:t + 1, :] for t in range(len(shifts))]   # each (1, H*W)

    for n in range(batch_block):                       # small static unroll
        xb = x_ref[n]                                  # (Cin, H*W), H*W in lanes
        cols = []
        for t, sh in enumerate(shifts):
            # Circular lane rotation brings source pixel (y+dy, x+dx) to (y, x);
            # out-of-image positions are zeroed by the precomputed mask.
            p = pltpu.roll(xb, shift=sh, axis=1) if sh != 0 else xb
            if needs_mask[t]:
                p = p * masks[t]
            cols.append(p)
        col = jnp.concatenate(cols, axis=0)            # (K, H*W) im2col slab
        acc = jnp.dot(w, col, preferred_element_type=jnp.float32) + bias
        o_ref[n] = acc.astype(o_ref.dtype)             # lane-dense (NL, H*W) store


def _pick_batch_block(n, max_block=8):
    """Largest divisor of n that is <= max_block, keeping >= 2 grid blocks
    (both v7x TensorCores busy) whenever n >= 2."""
    best = 1
    for b in range(1, min(n, max_block) + 1):
        if n % b == 0 and (n // b >= 2 or n == 1):
            best = b
    return best


def classifier_module_forward(x_nchw, weights, biases, dilations, *,
                              compute_dtype=jnp.float32):
    """Pallas TPU forward of Classifier_Module.

    x_nchw  : (N, Cin, H, W)
    weights : (NB, NoLabels, Cin, 3, 3)   PyTorch Conv2d weight layout per branch
    biases  : (NB, NoLabels)
    Returns (N, NoLabels, H, W) float32 == sum_b conv2d_b(x)  (3x3, stride 1,
    padding == dilation, bias).
    """
    n, cin, h, w = x_nchw.shape
    nb, nl = biases.shape
    hw = h * w

    # ---- pack taps: dedupe identical (dy, dx) offsets (e.g. the centre tap shared
    # by all branches) and drop taps that never overlap the image.  The fused
    # weight becomes a flat (NL, K) matrix with K = n_taps * Cin.
    tap_index = {}
    w_blocks = []                     # list of (NL, Cin)
    offsets = []                      # list of (dy, dx)
    for b, d in enumerate(dilations):
        for ky in range(3):
            for kx in range(3):
                dy, dx = (ky - 1) * d, (kx - 1) * d
                if abs(dy) >= h or abs(dx) >= w:
                    continue          # tap only ever reads zero padding
                wk = weights[b, :, :, ky, kx]      # (NL, Cin)
                key = (dy, dx)
                if key in tap_index:
                    t = tap_index[key]
                    w_blocks[t] = w_blocks[t] + wk
                else:
                    tap_index[key] = len(w_blocks)
                    w_blocks.append(wk)
                    offsets.append(key)
    n_taps = len(offsets)
    k = n_taps * cin

    w2 = jnp.concatenate(w_blocks, axis=1).astype(compute_dtype)       # (NL, K)
    bias_sum = jnp.sum(biases.astype(jnp.float32), axis=0).reshape(nl, 1)

    # ---- per-tap flat lane shift and 0/1 boundary mask (host-side constants).
    ys, xs = np.divmod(np.arange(hw), w)
    masks = np.empty((n_taps, hw), dtype=np.float32)
    shifts, needs_mask = [], []
    for t, (dy, dx) in enumerate(offsets):
        valid = ((ys + dy >= 0) & (ys + dy < h) &
                 (xs + dx >= 0) & (xs + dx < w))
        masks[t] = valid.astype(np.float32)
        shifts.append(int((-(dy * w + dx)) % hw))      # non-negative roll amount
        needs_mask.append(not (dy == 0 and dx == 0))
    masks = jnp.asarray(masks, dtype=compute_dtype)

    x_flat = x_nchw.reshape(n, cin, hw).astype(compute_dtype)   # free HBM reshape

    bb = _pick_batch_block(n)
    grid = (n // bb,)

    kernel = functools.partial(
        _aspp_kernel, batch_block=bb,
        shifts=tuple(shifts), needs_mask=tuple(needs_mask))

    # TODO(synk): for production ASPP sizes (Cin ~ 512-2048) add a Cin-reduction grid
    # axis ("arbitrary", accumulator init via pl.when) / spatial tiling so the
    # double-buffered input tile fits v7x's smaller 64 MiB VMEM; at these demo sizes
    # a whole image block per step is optimal.
    out = pl.pallas_call(
        kernel,
        out_shape=jax.ShapeDtypeStruct((n, nl, hw), jnp.float32),
        grid_spec=pltpu.PrefetchScalarGridSpec(
            num_scalar_prefetch=0,
            grid=grid,
            in_specs=[
                pl.BlockSpec((bb, cin, hw), lambda i: (i, 0, 0)),
                # Constant index_maps: weights / bias / masks stay resident in VMEM
                # (not re-DMA'd per grid step).
                pl.BlockSpec((nl, k), lambda i: (0, 0)),
                pl.BlockSpec((nl, 1), lambda i: (0, 0)),
                pl.BlockSpec((n_taps, hw), lambda i: (0, 0)),
            ],
            out_specs=pl.BlockSpec((bb, nl, hw), lambda i: (i, 0, 0)),
        ),
        compiler_params=pltpu.CompilerParams(
            dimension_semantics=("parallel",)),
    )(x_flat, w2, bias_sum, masks)

    return out.reshape(n, nl, h, w)                    # free reshape, already NCHW


def _reference_forward(x_nchw, weights, biases, dilations):
    """Pure-JAX reference using lax.conv_general_dilated (NCHW, like PyTorch)."""
    out = None
    for i, d in enumerate(dilations):
        y = jax.lax.conv_general_dilated(
            x_nchw, weights[i],
            window_strides=(1, 1),
            padding=((d, d), (d, d)),
            rhs_dilation=(d, d),
            dimension_numbers=("NCHW", "OIHW", "NCHW"),
        ) + biases[i][None, :, None, None]
        out = y if out is None else out + y
    return out


if __name__ == "__main__":
    cin, h, w = 4, 16, 16
    no_labels = 3
    dilation_series = [1, 2, 3, 4]          # padding == dilation, as used in OCENet
    nb = len(dilation_series)

    key = jax.random.PRNGKey(0)
    kx_, kw_, kb_ = jax.random.split(key, 3)
    weights = 0.01 * jax.random.normal(kw_, (nb, no_labels, cin, 3, 3), jnp.float32)
    biases = 0.05 * jax.random.normal(kb_, (nb, no_labels), jnp.float32)

    # 1) main check: N=2 (one image per grid step -> 2 parallel grid blocks), f32.
    x2 = jax.random.normal(kx_, (2, cin, h, w), dtype=jnp.float32)
    out = jax.block_until_ready(
        classifier_module_forward(x2, weights, biases, dilation_series))
    ref = _reference_forward(x2, weights, biases, dilation_series)
    assert out.shape == (2, no_labels, h, w)
    assert jnp.allclose(out, ref, atol=1e-4, rtol=1e-4), "f32 mismatch vs reference"

    # 2) batch-blocked path: N=4 -> 2 images per grid step, still 2 grid blocks.
    x4 = jax.random.normal(jax.random.PRNGKey(1), (4, cin, h, w), dtype=jnp.float32)
    out4 = jax.block_until_ready(
        classifier_module_forward(x4, weights, biases, dilation_series))
    ref4 = _reference_forward(x4, weights, biases, dilation_series)
    assert jnp.allclose(out4, ref4, atol=1e-4, rtol=1e-4), "blocked-batch mismatch"

    # 3) bf16 compute path (f32 MXU accumulation), looser tolerance.
    out_bf = jax.block_until_ready(
        classifier_module_forward(x2, weights, biases, dilation_series,
                                  compute_dtype=jnp.bfloat16))
    assert jnp.allclose(out_bf, ref, atol=5e-2, rtol=5e-2), "bf16 mismatch"

    print("KERNEL_OK")
</pallas_src>

<mosaic_0001>
module attributes {stable_mosaic.version = 11 : i64} {
  func.func @_aspp_kernel(%arg0: i32, %arg1: memref<1x4x256xf32, #tpu.memory_space<vmem>>, %arg2: memref<3x132xf32, #tpu.memory_space<vmem>>, %arg3: memref<3x1xf32, #tpu.memory_space<vmem>>, %arg4: memref<33x256xf32, #tpu.memory_space<vmem>>, %arg5: memref<1x3x256xf32, #tpu.memory_space<vmem>>) attributes {dimension_semantics = [#tpu.dimension_semantics<parallel>], iteration_bounds = array<i64: 2>, scalar_prefetch = 0 : i64, scratch_operands = 0 : i64, tpu.core_type = #tpu.core_type<tc>, window_params = [{transform_indices = @transform_0, window_bounds = array<i64: 1, 4, 256>}, {pipeline_mode = #tpu.pipeline_mode<synchronous>, transform_indices = @transform_1, window_bounds = array<i64: 3, 132>}, {pipeline_mode = #tpu.pipeline_mode<synchronous>, transform_indices = @transform_2, window_bounds = array<i64: 3, 1>}, {pipeline_mode = #tpu.pipeline_mode<synchronous>, transform_indices = @transform_3, window_bounds = array<i64: 33, 256>}, {transform_indices = @transform_4, window_bounds = array<i64: 1, 3, 256>}]} {
    %c0 = arith.constant 0 : index
    %c0_0 = arith.constant 0 : index
    %0 = vector.load %arg2[%c0, %c0_0] : memref<3x132xf32, #tpu.memory_space<vmem>>, vector<3x132xf32>
    %c0_1 = arith.constant 0 : index
    %c0_2 = arith.constant 0 : index
    %1 = vector.load %arg3[%c0_1, %c0_2] : memref<3x1xf32, #tpu.memory_space<vmem>>, vector<3x1xf32>
    %c0_3 = arith.constant 0 : index
    %c0_4 = arith.constant 0 : index
    %2 = vector.load %arg4[%c0_3, %c0_4] : memref<33x256xf32, #tpu.memory_space<vmem>>, vector<1x256xf32>
    %c1 = arith.constant 1 : index
    %c0_5 = arith.constant 0 : index
    %3 = vector.load %arg4[%c1, %c0_5] : memref<33x256xf32, #tpu.memory_space<vmem>>, vector<1x256xf32>
    %c2 = arith.constant 2 : index
    %c0_6 = arith.constant 0 : index
    %4 = vector.load %arg4[%c2, %c0_6] : memref<33x256xf32, #tpu.memory_space<vmem>>, vector<1x256xf32>
    %c3 = arith.constant 3 : index
    %c0_7 = arith.constant 0 : index
    %5 = vector.load %arg4[%c3, %c0_7] : memref<33x256xf32, #tpu.memory_space<vmem>>, vector<1x256xf32>
    %c5 = arith.constant 5 : index
    %c0_8 = arith.constant 0 : index
    %6 = vector.load %arg4[%c5, %c0_8] : memref<33x256xf32, #tpu.memory_space<vmem>>, vector<1x256xf32>
    %c6 = arith.constant 6 : index
    %c0_9 = arith.constant 0 : index
    %7 = vector.load %arg4[%c6, %c0_9] : memref<33x256xf32, #tpu.memory_space<vmem>>, vector<1x256xf32>
    %c7 = arith.constant 7 : index
    %c0_10 = arith.constant 0 : index
    %8 = vector.load %arg4[%c7, %c0_10] : memref<33x256xf32, #tpu.memory_space<vmem>>, vector<1x256xf32>
    %c8 = arith.constant 8 : index
    %c0_11 = arith.constant 0 : index
    %9 = vector.load %arg4[%c8, %c0_11] : memref<33x256xf32, #tpu.memory_space<vmem>>, vector<1x256xf32>
    %c9 = arith.constant 9 : index
    %c0_12 = arith.constant 0 : index
    %10 = vector.load %arg4[%c9, %c0_12] : memref<33x256xf32, #tpu.memory_space<vmem>>, vector<1x256xf32>
    %c10 = arith.constant 10 : index
    %c0_13 = arith.constant 0 : index
    %11 = vector.load %arg4[%c10, %c0_13] : memref<33x256xf32, #tpu.memory_space<vmem>>, vector<1x256xf32>
    %c11 = arith.constant 11 : index
    %c0_14 = arith.constant 0 : index
    %12 = vector.load %arg4[%c11, %c0_14] : memref<33x256xf32, #tpu.memory_space<vmem>>, vector<1x256xf32>
    %c12 = arith.constant 12 : index
    %c0_15 = arith.constant 0 : index
    %13 = vector.load %arg4[%c12, %c0_15] : memref<33x256xf32, #tpu.memory_space<vmem>>, vector<1x256xf32>
    %c13 = arith.constant 13 : index
    %c0_16 = arith.constant 0 : index
    %14 = vector.load %arg4[%c13, %c0_16] : memref<33x256xf32, #tpu.memory_space<vmem>>, vector<1x256xf32>
    %c14 = arith.constant 14 : index
    %c0_17 = arith.constant 0 : index
    %15 = vector.load %arg4[%c14, %c0_17] : memref<33x256xf32, #tpu.memory_space<vmem>>, vector<1x256xf32>
    %c15 = arith.constant 15 : index
    %c0_18 = arith.constant 0 : index
    %16 = vector.load %arg4[%c15, %c0_18] : memref<33x256xf32, #tpu.memory_space<vmem>>, vector<1x256xf32>
    %c16 = arith.constant 16 : index
    %c0_19 = arith.constant 0 : index
    %17 = vector.load %arg4[%c16, %c0_19] : memref<33x256xf32, #tpu.memory_space<vmem>>, vector<1x256xf32>
    %c17 = arith.constant 17 : index
    %c0_20 = arith.constant 0 : index
    %18 = vector.load %arg4[%c17, %c0_20] : memref<33x256xf32, #tpu.memory_space<vmem>>, vector<1x256xf32>
    %c18 = arith.constant 18 : index
    %c0_21 = arith.constant 0 : index
    %19 = vector.load %arg4[%c18, %c0_21] : memref<33x256xf32, #tpu.memory_space<vmem>>, vector<1x256xf32>
    %c19 = arith.constant 19 : index
    %c0_22 = arith.constant 0 : index
    %20 = vector.load %arg4[%c19, %c0_22] : memref<33x256xf32, #tpu.memory_space<vmem>>, vector<1x256xf32>
    %c20 = arith.constant 20 : index
    %c0_23 = arith.constant 0 : index
    %21 = vector.load %arg4[%c20, %c0_23] : memref<33x256xf32, #tpu.memory_space<vmem>>, vector<1x256xf32>
    %c21 = arith.constant 21 : index
    %c0_24 = arith.constant 0 : index
    %22 = vector.load %arg4[%c21, %c0_24] : memref<33x256xf32, #tpu.memory_space<vmem>>, vector<1x256xf32>
    %c22 = arith.constant 22 : index
    %c0_25 = arith.constant 0 : index
    %23 = vector.load %arg4[%c22, %c0_25] : memref<33x256xf32, #tpu.memory_space<vmem>>, vector<1x256xf32>
    %c23 = arith.constant 23 : index
    %c0_26 = arith.constant 0 : index
    %24 = vector.load %arg4[%c23, %c0_26] : memref<33x256xf32, #tpu.memory_space<vmem>>, vector<1x256xf32>
    %c24 = arith.constant 24 : index
    %c0_27 = arith.constant 0 : index
    %25 = vector.load %arg4[%c24, %c0_27] : memref<33x256xf32, #tpu.memory_space<vmem>>, vector<1x256xf32>
    %c25 = arith.constant 25 : index
    %c0_28 = arith.constant 0 : index
    %26 = vector.load %arg4[%c25, %c0_28] : memref<33x256xf32, #tpu.memory_space<vmem>>, vector<1x256xf32>
    %c26 = arith.constant 26 : index
    %c0_29 = arith.constant 0 : index
    %27 = vector.load %arg4[%c26, %c0_29] : memref<33x256xf32, #tpu.memory_space<vmem>>, vector<1x256xf32>
    %c27 = arith.constant 27 : index
    %c0_30 = arith.constant 0 : index
    %28 = vector.load %arg4[%c27, %c0_30] : memref<33x256xf32, #tpu.memory_space<vmem>>, vector<1x256xf32>
    %c28 = arith.constant 28 : index
    %c0_31 = arith.constant 0 : index
    %29 = vector.load %arg4[%c28, %c0_31] : memref<33x256xf32, #tpu.memory_space<vmem>>, vector<1x256xf32>
    %c29 = arith.constant 29 : index
    %c0_32 = arith.constant 0 : index
    %30 = vector.load %arg4[%c29, %c0_32] : memref<33x256xf32, #tpu.memory_space<vmem>>, vector<1x256xf32>
    %c30 = arith.constant 30 : index
    %c0_33 = arith.constant 0 : index
    %31 = vector.load %arg4[%c30, %c0_33] : memref<33x256xf32, #tpu.memory_space<vmem>>, vector<1x256xf32>
    %c31 = arith.constant 31 : index
    %c0_34 = arith.constant 0 : index
    %32 = vector.load %arg4[%c31, %c0_34] : memref<33x256xf32, #tpu.memory_space<vmem>>, vector<1x256xf32>
    %c32 = arith.constant 32 : index
    %c0_35 = arith.constant 0 : index
    %33 = vector.load %arg4[%c32, %c0_35] : memref<33x256xf32, #tpu.memory_space<vmem>>, vector<1x256xf32>
    %c0_36 = arith.constant 0 : index
    %c0_37 = arith.constant 0 : index
    %c0_38 = arith.constant 0 : index
    %34 = vector.load %arg1[%c0_36, %c0_37, %c0_38] : memref<1x4x256xf32, #tpu.memory_space<vmem>>, vector<1x4x256xf32>
    %35 = vector.shape_cast %34 : vector<1x4x256xf32> to vector<4x256xf32>
    %c17_i32 = arith.constant 17 : i32
    %36 = tpu.dynamic_rotate %35 by %c17_i32 dim 1 : vector<4x256xf32>, i32 -> vector<4x256xf32>
    %37 = vector.broadcast %2 : vector<1x256xf32> to vector<4x256xf32>
    %38 = arith.mulf %36, %37 : vector<4x256xf32>
    %c16_i32 = arith.constant 16 : i32
    %39 = tpu.dynamic_rotate %35 by %c16_i32 dim 1 : vector<4x256xf32>, i32 -> vector<4x256xf32>
    %40 = vector.broadcast %3 : vector<1x256xf32> to vector<4x256xf32>
    %41 = arith.mulf %39, %40 : vector<4x256xf32>
    %c15_i32 = arith.constant 15 : i32
    %42 = tpu.dynamic_rotate %35 by %c15_i32 dim 1 : vector<4x256xf32>, i32 -> vector<4x256xf32>
    %43 = vector.broadcast %4 : vector<1x256xf32> to vector<4x256xf32>
    %44 = arith.mulf %42, %43 : vector<4x256xf32>
    %c1_i32 = arith.constant 1 : i32
    %45 = tpu.dynamic_rotate %35 by %c1_i32 dim 1 : vector<4x256xf32>, i32 -> vector<4x256xf32>
    %46 = vector.broadcast %5 : vector<1x256xf32> to vector<4x256xf32>
    %47 = arith.mulf %45, %46 : vector<4x256xf32>
    %c255_i32 = arith.constant 255 : i32
    %48 = tpu.dynamic_rotate %35 by %c255_i32 dim 1 : vector<4x256xf32>, i32 -> vector<4x256xf32>
    %49 = vector.broadcast %6 : vector<1x256xf32> to vector<4x256xf32>
    %50 = arith.mulf %48, %49 : vector<4x256xf32>
    %c241_i32 = arith.constant 241 : i32
    %51 = tpu.dynamic_rotate %35 by %c241_i32 dim 1 : vector<4x256xf32>, i32 -> vector<4x256xf32>
    %52 = vector.broadcast %7 : vector<1x256xf32> to vector<4x256xf32>
    %53 = arith.mulf %51, %52 : vector<4x256xf32>
    %c240_i32 = arith.constant 240 : i32
    %54 = tpu.dynamic_rotate %35 by %c240_i32 dim 1 : vector<4x256xf32>, i32 -> vector<4x256xf32>
    %55 = vector.broadcast %8 : vector<1x256xf32> to vector<4x256xf32>
    %56 = arith.mulf %54, %55 : vector<4x256xf32>
    %c239_i32 = arith.constant 239 : i32
    %57 = tpu.dynamic_rotate %35 by %c239_i32 dim 1 : vector<4x256xf32>, i32 -> vector<4x256xf32>
    %58 = vector.broadcast %9 : vector<1x256xf32> to vector<4x256xf32>
    %59 = arith.mulf %57, %58 : vector<4x256xf32>
    %c34_i32 = arith.constant 34 : i32
    %60 = tpu.dynamic_rotate %35 by %c34_i32 dim 1 : vector<4x256xf32>, i32 -> vector<4x256xf32>
    %61 = vector.broadcast %10 : vector<1x256xf32> to vector<4x256xf32>
    %62 = arith.mulf %60, %61 : vector<4x256xf32>
    %c32_i32 = arith.constant 32 : i32
    %63 = tpu.dynamic_rotate %35 by %c32_i32 dim 1 : vector<4x256xf32>, i32 -> vector<4x256xf32>
    %64 = vector.broadcast %11 : vector<1x256xf32> to vector<4x256xf32>
    %65 = arith.mulf %63, %64 : vector<4x256xf32>
    %c30_i32 = arith.constant 30 : i32
    %66 = tpu.dynamic_rotate %35 by %c30_i32 dim 1 : vector<4x256xf32>, i32 -> vector<4x256xf32>
    %67 = vector.broadcast %12 : vector<1x256xf32> to vector<4x256xf32>
    %68 = arith.mulf %66, %67 : vector<4x256xf32>
    %c2_i32 = arith.constant 2 : i32
    %69 = tpu.dynamic_rotate %35 by %c2_i32 dim 1 : vector<4x256xf32>, i32 -> vector<4x256xf32>
    %70 = vector.broadcast %13 : vector<1x256xf32> to vector<4x256xf32>
    %71 = arith.mulf %69, %70 : vector<4x256xf32>
    %c254_i32 = arith.constant 254 : i32
    %72 = tpu.dynamic_rotate %35 by %c254_i32 dim 1 : vector<4x256xf32>, i32 -> vector<4x256xf32>
    %73 = vector.broadcast %14 : vector<1x256xf32> to vector<4x256xf32>
    %74 = arith.mulf %72, %73 : vector<4x256xf32>
    %c226_i32 = arith.constant 226 : i32
    %75 = tpu.dynamic_rotate %35 by %c226_i32 dim 1 : vector<4x256xf32>, i32 -> vector<4x256xf32>
    %76 = vector.broadcast %15 : vector<1x256xf32> to vector<4x256xf32>
    %77 = arith.mulf %75, %76 : vector<4x256xf32>
    %c224_i32 = arith.constant 224 : i32
    %78 = tpu.dynamic_rotate %35 by %c224_i32 dim 1 : vector<4x256xf32>, i32 -> vector<4x256xf32>
    %79 = vector.broadcast %16 : vector<1x256xf32> to vector<4x256xf32>
    %80 = arith.mulf %78, %79 : vector<4x256xf32>
    %c222_i32 = arith.constant 222 : i32
    %81 = tpu.dynamic_rotate %35 by %c222_i32 dim 1 : vector<4x256xf32>, i32 -> vector<4x256xf32>
    %82 = vector.broadcast %17 : vector<1x256xf32> to vector<4x256xf32>
    %83 = arith.mulf %81, %82 : vector<4x256xf32>
    %c51_i32 = arith.constant 51 : i32
    %84 = tpu.dynamic_rotate %35 by %c51_i32 dim 1 : vector<4x256xf32>, i32 -> vector<4x256xf32>
    %85 = vector.broadcast %18 : vector<1x256xf32> to vector<4x256xf32>
    %86 = arith.mulf %84, %85 : vector<4x256xf32>
    %c48_i32 = arith.constant 48 : i32
    %87 = tpu.dynamic_rotate %35 by %c48_i32 dim 1 : vector<4x256xf32>, i32 -> vector<4x256xf32>
    %88 = vector.broadcast %19 : vector<1x256xf32> to vector<4x256xf32>
    %89 = arith.mulf %87, %88 : vector<4x256xf32>
    %c45_i32 = arith.constant 45 : i32
    %90 = tpu.dynamic_rotate %35 by %c45_i32 dim 1 : vector<4x256xf32>, i32 -> vector<4x256xf32>
    %91 = vector.broadcast %20 : vector<1x256xf32> to vector<4x256xf32>
    %92 = arith.mulf %90, %91 : vector<4x256xf32>
    %c3_i32 = arith.constant 3 : i32
    %93 = tpu.dynamic_rotate %35 by %c3_i32 dim 1 : vector<4x256xf32>, i32 -> vector<4x256xf32>
    %94 = vector.broadcast %21 : vector<1x256xf32> to vector<4x256xf32>
    %95 = arith.mulf %93, %94 : vector<4x256xf32>
    %c253_i32 = arith.constant 253 : i32
    %96 = tpu.dynamic_rotate %35 by %c253_i32 dim 1 : vector<4x256xf32>, i32 -> vector<4x256xf32>
    %97 = vector.broadcast %22 : vector<1x256xf32> to vector<4x256xf32>
    %98 = arith.mulf %96, %97 : vector<4x256xf32>
    %c211_i32 = arith.constant 211 : i32
    %99 = tpu.dynamic_rotate %35 by %c211_i32 dim 1 : vector<4x256xf32>, i32 -> vector<4x256xf32>
    %100 = vector.broadcast %23 : vector<1x256xf32> to vector<4x256xf32>
    %101 = arith.mulf %99, %100 : vector<4x256xf32>
    %c208_i32 = arith.constant 208 : i32
    %102 = tpu.dynamic_rotate %35 by %c208_i32 dim 1 : vector<4x256xf32>, i32 -> vector<4x256xf32>
    %103 = vector.broadcast %24 : vector<1x256xf32> to vector<4x256xf32>
    %104 = arith.mulf %102, %103 : vector<4x256xf32>
    %c205_i32 = arith.constant 205 : i32
    %105 = tpu.dynamic_rotate %35 by %c205_i32 dim 1 : vector<4x256xf32>, i32 -> vector<4x256xf32>
    %106 = vector.broadcast %25 : vector<1x256xf32> to vector<4x256xf32>
    %107 = arith.mulf %105, %106 : vector<4x256xf32>
    %c68_i32 = arith.constant 68 : i32
    %108 = tpu.dynamic_rotate %35 by %c68_i32 dim 1 : vector<4x256xf32>, i32 -> vector<4x256xf32>
    %109 = vector.broadcast %26 : vector<1x256xf32> to vector<4x256xf32>
    %110 = arith.mulf %108, %109 : vector<4x256xf32>
    %c64_i32 = arith.constant 64 : i32
    %111 = tpu.dynamic_rotate %35 by %c64_i32 dim 1 : vector<4x256xf32>, i32 -> vector<4x256xf32>
    %112 = vector.broadcast %27 : vector<1x256xf32> to vector<4x256xf32>
    %113 = arith.mulf %111, %112 : vector<4x256xf32>
    %c60_i32 = arith.constant 60 : i32
    %114 = tpu.dynamic_rotate %35 by %c60_i32 dim 1 : vector<4x256xf32>, i32 -> vector<4x256xf32>
    %115 = vector.broadcast %28 : vector<1x256xf32> to vector<4x256xf32>
    %116 = arith.mulf %114, %115 : vector<4x256xf32>
    %c4_i32 = arith.constant 4 : i32
    %117 = tpu.dynamic_rotate %35 by %c4_i32 dim 1 : vector<4x256xf32>, i32 -> vector<4x256xf32>
    %118 = vector.broadcast %29 : vector<1x256xf32> to vector<4x256xf32>
    %119 = arith.mulf %117, %118 : vector<4x256xf32>
    %c252_i32 = arith.constant 252 : i32
    %120 = tpu.dynamic_rotate %35 by %c252_i32 dim 1 : vector<4x256xf32>, i32 -> vector<4x256xf32>
    %121 = vector.broadcast %30 : vector<1x256xf32> to vector<4x256xf32>
    %122 = arith.mulf %120, %121 : vector<4x256xf32>
    %c196_i32 = arith.constant 196 : i32
    %123 = tpu.dynamic_rotate %35 by %c196_i32 dim 1 : vector<4x256xf32>, i32 -> vector<4x256xf32>
    %124 = vector.broadcast %31 : vector<1x256xf32> to vector<4x256xf32>
    %125 = arith.mulf %123, %124 : vector<4x256xf32>
    %c192_i32 = arith.constant 192 : i32
    %126 = tpu.dynamic_rotate %35 by %c192_i32 dim 1 : vector<4x256xf32>, i32 -> vector<4x256xf32>
    %127 = vector.broadcast %32 : vector<1x256xf32> to vector<4x256xf32>
    %128 = arith.mulf %126, %127 : vector<4x256xf32>
    %c188_i32 = arith.constant 188 : i32
    %129 = tpu.dynamic_rotate %35 by %c188_i32 dim 1 : vector<4x256xf32>, i32 -> vector<4x256xf32>
    %130 = vector.broadcast %33 : vector<1x256xf32> to vector<4x256xf32>
    %131 = arith.mulf %129, %130 : vector<4x256xf32>
    %132 = tpu.concatenate %38, %41, %44, %47, %35, %50, %53, %56, %59, %62, %65, %68, %71, %74, %77, %80 in 0 : vector<4x256xf32>, vector<4x256xf32>, vector<4x256xf32>, vector<4x256xf32>, vector<4x256xf32>, vector<4x256xf32>, vector<4x256xf32>, vector<4x256xf32>, vector<4x256xf32>, vector<4x256xf32>, vector<4x256xf32>, vector<4x256xf32>, vector<4x256xf32>, vector<4x256xf32>, vector<4x256xf32>, vector<4x256xf32> -> vector<64x256xf32>
    %133 = tpu.concatenate %83, %86, %89, %92, %95, %98, %101, %104, %107, %110, %113, %116, %119, %122, %125, %128 in 0 : vector<4x256xf32>, vector<4x256xf32>, vector<4x256xf32>, vector<4x256xf32>, vector<4x256xf32>, vector<4x256xf32>, vector<4x256xf32>, vector<4x256xf32>, vector<4x256xf32>, vector<4x256xf32>, vector<4x256xf32>, vector<4x256xf32>, vector<4x256xf32>, vector<4x256xf32>, vector<4x256xf32>, vector<4x256xf32> -> vector<64x256xf32>
    %134 = tpu.concatenate %132, %133, %131 in 0 : vector<64x256xf32>, vector<64x256xf32>, vector<4x256xf32> -> vector<132x256xf32>
    %cst = arith.constant dense<0.000000e+00> : vector<3x256xf32>
    %135 = tpu.matmul %0, %134, %cst {dimension_numbers = #tpu.dot_dimension_numbers<[1], [0], [0], [1], [0, 0, 1, 1], [], []>} : vector<3x132xf32>, vector<132x256xf32>, vector<3x256xf32> -> vector<3x256xf32>
    %136 = vector.broadcast %1 : vector<3x1xf32> to vector<3x256xf32>
    %137 = arith.addf %135, %136 : vector<3x256xf32>
    %c0_39 = arith.constant 0 : index
    %c0_40 = arith.constant 0 : index
    %c0_41 = arith.constant 0 : index
    %138 = vector.load %arg5[%c0_39, %c0_40, %c0_41] : memref<1x3x256xf32, #tpu.memory_space<vmem>>, vector<1x3x256xf32>
    %139 = vector.shape_cast %138 : vector<1x3x256xf32> to vector<3x256xf32>
    %140 = vector.shape_cast %137 : vector<3x256xf32> to vector<1x3x256xf32>
    tpu.vector_store %arg5[%c0_39, %c0_40, %c0_41], %140 {strides = array<i32>} : memref<1x3x256xf32, #tpu.memory_space<vmem>>, vector<1x3x256xf32>,
    return
  }
  func.func @transform_0(%arg0: i32) -> (i32, i32, i32) {
    %c0_i32 = arith.constant 0 : i32
    %c0_i32_0 = arith.constant 0 : i32
    %c0_i32_1 = arith.constant 0 : i32
    return %arg0, %c0_i32, %c0_i32_0 : i32, i32, i32
  }
  func.func @transform_1(%arg0: i32) -> (i32, i32) {
    %c0_i32 = arith.constant 0 : i32
    %c0_i32_0 = arith.constant 0 : i32
    %c0_i32_1 = arith.constant 0 : i32
    return %c0_i32, %c0_i32_0 : i32, i32
  }
  func.func @transform_2(%arg0: i32) -> (i32, i32) {
    %c0_i32 = arith.constant 0 : i32
    %c0_i32_0 = arith.constant 0 : i32
    %c0_i32_1 = arith.constant 0 : i32
    return %c0_i32, %c0_i32_0 : i32, i32
  }
  func.func @transform_3(%arg0: i32) -> (i32, i32) {
    %c0_i32 = arith.constant 0 : i32
    %c0_i32_0 = arith.constant 0 : i32
    %c0_i32_1 = arith.constant 0 : i32
    return %c0_i32, %c0_i32_0 : i32, i32
  }
  func.func @transform_4(%arg0: i32) -> (i32, i32, i32) {
    %c0_i32 = arith.constant 0 : i32
    %c0_i32_0 = arith.constant 0 : i32
    %c0_i32_1 = arith.constant 0 : i32
    return %arg0, %c0_i32, %c0_i32_0 : i32, i32, i32
  }
}

</mosaic_0001>

<bundles_post_ra>
// kernel: tpu_custom_call.1
= control target key start
LH: loop header
LB: loop body
LE: loop exit
PB: predicated region body
PF: predicated region fallthrough
CT: control target
= control target key end

     0   :  { %9 = vsyncpa [#allocation3], 0  ;;  %s1911_s0 = inlined_call_operand.hbm [shape: f32[2,4,256], index: 0, kind: input, shape index: {}]   ;;  %s1912_s1 = inlined_call_operand.hbm [shape: f32[3,132], index: 1, kind: input, shape index: {}]   ;;  %s1913_s2 = inlined_call_operand.vmem [shape: f32[3,1], index: 2, kind: input, shape index: {}]   ;;  %s1914_s3 = inlined_call_operand.hbm [shape: f32[33,256], index: 3, kind: input, shape index: {}]   ;;  %s1915_s4 = inlined_call_operand.vmem [shape: f32[2,3,256], index: 4, kind: output, shape index: {}]  }
   0x1   :  { %11 = vsyncpa [#allocation3 + $0x1], 0 }
   0x2   :  { %12 = vsyncpa [#allocation5], 0  ;;  %s1536_s15 = smov 0   ;;  %s1538_s16 = smov 0  }
   0x3   :  { %s1540_s17 = smov 0   ;;  %s1542_s18 = smov 0  }
   0x4 LB: > { %s1555_s19 = sadd.s32 4294967295, %s1474_s18   ;;  %p38_p0 = scmp.ne.s32.totalorder %s1466_s16, %s1462_s15  ;;  %s1474_s18 = sphi %s1542_s18, %s1930_s18   ;;  %s1470_s17 = sphi %s1540_s17, %s1929_s17   ;;  %s1466_s16 = sphi %s1538_s16, %s1928_s16   ;;  %s1462_s15 = sphi %s1536_s15, %s1927_s15  }
   0x5   : > { %p1916_p1 = scmp.eq.s32.totalorder %s1555_s19, 0  ;;  %p1241_p2 = scmp.ge.s32.totalorder %s1474_s18, 1 }
   0x6   : > { %p138_p3 = scmp.lt.s32.totalorder %s1474_s18, 3  ;;  %s1476_s22 = smov [#allocation4]  }
   0x7   : > { %p1563_p4 = por %p1916_p1, %p38_p0  ;;  %s151_s23 = sshll.u32 %s1476_s22, 4  ;;  %s152_s23 = int_to_ptr.vmem [resolvable:$true] %s151_s23 }
   0x8   : > { %p1567_p5 = pnand %p1241_p2, %p138_p3  ;;  %s1477_s24 = smov [#allocation6]  }
   0x9   : > { %s1919_s20 = scalar_select %p1563_p4, 1, 0 }
   0xa   : > { %s1920_s21 = scalar_select %p1567_p5, 1, 0 }
   0xb   : > { %p1271_p6 = pneg %p1567_p5  ;;  %s164_s25 = sshll.u32 %s1477_s24, 4  ;;  %s165_s25 = int_to_ptr.vmem [resolvable:$true] %s164_s25 }
   0xc   : > { %s1367_s27 = scalar_lea.vmem %s152_s23, 128  ;;  %p1375_p12 = scmp.lt.s32.totalorder %s152_s23, %s152_s23 }
   0xd   : > { %p1575_p7 = pnand %p1271_p6, %p1916_p1  ;;  %p1368_p9 = scmp.ne.s32.totalorder %s152_s23, %s1367_s27 }
   0xe   : > { %p1376_p13 = scmp.lt.s32.totalorder %s1367_s27, %s1367_s27 }
   0xf   : > { %p1358_p8 = pneg %p1575_p7 }
  0x10   : > { %p1377_p0 = por %p1376_p13, %p1375_p12 }
  0x11   : > { %p1370_p10 = pnand %p1368_p9, %p1358_p8 }
  0x13   : > { %p1371_p11 = pneg %p1370_p10 }
  0x15   : > { %p1378_p2 = pnand %p1377_p0, %p1371_p11 }
  0x17   : > { %1381 = shalt.err (!%p1378_p2)
}
  0x18   : > { %1274 = dma.hbm_to_vmem [thread:$0]  (!%p1575_p7), %s1912_s1, 128, %s152_s23, [#allocation5]  }
  0x19   : > { %s1393_s30 = scalar_lea.vmem %s165_s25, 1280  ;;  %p1401_p9 = scmp.lt.s32.totalorder %s165_s25, %s165_s25 }
  0x1a   : > { %p1394_p3 = scmp.ne.s32.totalorder %s165_s25, %s1393_s30  ;;  %p1402_p10 = scmp.lt.s32.totalorder %s1393_s30, %s1393_s30 }
  0x1c   : > { %p1396_p6 = pnand %p1394_p3, %p1358_p8  ;;  %p1403_p4 = por %p1402_p10, %p1401_p9 }
  0x1e   : > { %p1397_p1 = pneg %p1396_p6 }
  0x20   : > { %p1404_p5 = pnand %p1403_p4, %p1397_p1 }
  0x22   : > { %1407 = shalt.err (!%p1404_p5)
}
  0x23   : > { %s1478_s5 = smov 256   ;;  %s1479_s6 = smov 16  }
  0x24   : > { %1277 = dma.hbm_to_vmem [thread:$0]  (!%p1575_p7), %s1914_s3, 1280, %s165_s25, [#allocation5], %s1478_s5, %s1478_s5, %s1479_s6  }
  0x25   : > { %s1598_s9 = sadd.s32 1, %s1474_s18   ;;  %s25_s10 = sadd.s32 1, %s1470_s17 }
  0x26   : > { %s22_s11 = ssub.s32 %s1474_s18, %s1598_s9  ;;  %p32_p1 = scmp.ne.s32.totalorder %s1470_s17, %s1466_s16 }
  0x27   : > { %p23_p4 = scmp.eq.s32.totalorder %s22_s11, 0  ;;  %p33_p5 = scmp.eq.s32.totalorder %s1474_s18, 0 }
  0x28   : > { %p1284_p8 = scmp.lt.s32.totalorder %s1474_s18, 2  ;;  %s178_s12 = sand.u32 1, %s1470_s17  }
  0x29   : > { %s1609_s13 = scalar_select %p23_p4, %s1470_s17, %s25_s10  }
  0x2a   : > { %p34_p11 = por %p33_p5, %p32_p1  ;;  %s1245_s14 = sshll.u32 %s178_s12, 3 }
  0x2b   : > { %s1259_s15 = sshll.u32 %s1474_s18, 7  ;;  %s182_s25 = scalar_lea.vmem [#allocation2], %s1245_s14 }
  0x2c   : > { %s1615_s24 = scalar_lea.hbm %s1911_s0, %s1259_s15  ;;  %s190_s26 = sshll.u32 %s182_s25, 4  ;;  %s191_s26 = int_to_ptr.vmem [resolvable:$true] %s190_s26 }
  0x2d   : > { %p1617_p7 = pnand %p1284_p8, %p34_p11  ;;  %s179_s28 = scalar_lea.sflag [#allocation3], %s178_s12 }
  0x2e   : > { %s1408_s29 = scalar_lea.hbm %s1615_s24, 128  ;;  %s1413_s5 = scalar_lea.hbm %s1911_s0, 256 }
  0x2f   : > { %p1409_p12 = scmp.ne.s32.totalorder %s1615_s24, %s1408_s29  ;;  %p1410_p13 = pneg %p1617_p7 }
  0x30   : > { %p1414_p3 = scmp.lt.s32.totalorder %s1615_s24, %s1911_s0  ;;  %p1415_p6 = scmp.lt.s32.totalorder %s1413_s5, %s1408_s29 }
  0x31   : > { %p1411_p0 = pnand %p1410_p13, %p1409_p12 }
  0x32   : > { %p1416_p9 = por %p1415_p6, %p1414_p3 }
  0x33   : > { %p1412_p2 = pneg %p1411_p0 }
  0x35   : > { %p1417_p10 = pnand %p1416_p9, %p1412_p2 }
  0x37   : > { %1420 = shalt.err (!%p1417_p10)
}
  0x38   : > { %s1421_s8 = scalar_lea.vmem %s191_s26, 128  ;;  %s1480_s10 = smov [#allocation2]  }
  0x39   : > { %p1422_p1 = scmp.ne.s32.totalorder %s191_s26, %s1421_s8  ;;  %s1426_s11 = sshll.u32 %s1480_s10, 4  ;;  %s1427_s11 = int_to_ptr.vmem [resolvable:$false] %s1426_s11 }
  0x3a   : > { %s1428_s12 = scalar_lea.vmem %s1427_s11, 256  ;;  %p1429_p8 = scmp.lt.s32.totalorder %s191_s26, %s1427_s11 }
  0x3b   : > { %p1424_p4 = pnand %p1422_p1, %p1410_p13  ;;  %p1430_p11 = scmp.lt.s32.totalorder %s1428_s12, %s1421_s8 }
  0x3d   : > { %p1425_p5 = pneg %p1424_p4  ;;  %p1431_p12 = por %p1430_p11, %p1429_p8 }
  0x3f   : > { %p1432_p0 = pnand %p1431_p12, %p1425_p5 }
  0x41   : > { %1435 = shalt.err (!%p1432_p0)
}
  0x42   : > { %1281 = dma.hbm_to_vmem [thread:$0]  (!%p1617_p7), %s1615_s24, 128, %s191_s26, %s179_s28  }
  0x43   : > { %p1923_p2 = scmp.ne.s32.totalorder %s1920_s21, 0 }
  0x44   : > { %s201_s14 = sand.u32 (!%p1923_p2), 1, %s1466_s16   ;;  %p1924_p13 = scmp.ne.s32.totalorder (!%p1923_p2), %s1919_s20, 0 }
  0x45   : > { %199 = sbr.rel (%p1923_p2) target bundleno = 514 (0x202), region = 36  ;;  %s1249_s15 = sshll.u32 (!%p1923_p2), %s201_s14, 3 }
  0x46   : > { %s202_s22 = scalar_lea.sflag (!%p1923_p2), [#allocation3], %s201_s14  ;;  %s205_s23 = scalar_lea.vmem (!%p1923_p2), [#allocation2], %s1249_s15 }
  0x4a   : > { %1453 = dma.done.wait (%p1924_p13), %s202_s22, 128  }
  0x4b   : > { %1455 = vsyncadd (%p1924_p13), %s202_s22, 4294967168  ;;  %p1925_p3 = scmp.eq.s32.totalorder %s1555_s19, 0 }
  0x4d   : > { %1457 = dma.done.wait (%p1925_p3), [#allocation5], 1408   ;;  %p1926_p6 = pmov %p1925_p3 }
  0x4e   : > { %v1646_v0 = vld [vmem:[%s205_s23] sm:$0xff]  ;;  %s1481_s21 = smov 68   ;;  %s1482_s24 = smov 64   ;;  %v1706_v2 = vld [vmem:[#allocation4] sm:$0x77]  ;;  %vm1069_vm0 = vcmask 31744   ;;  %v316_v5 = vlaneseq }
  0x4f   : > { %1459 = vsyncadd (%p1926_p6), [#allocation5], 4294965888  ;;  %794 = vrot.lane.b32.xlu1 %v1646_v0, %s1481_s21  ;;  %814 = vrot.lane.b32.xlu0 %v1646_v0, %s1482_s24  ;;  %v1652_v1 = vcombine.high %v1646_v0, %v1646_v0  ;;  %s1483_s20 = smov 124   ;;  %s1484_s25 = smov 60   ;;  %v1068_v3 = vcombine.high %v1706_v2, %v1706_v2  ;;  %v1509_v4 = vmov 0   ;;  %vm981_vm5 = vcmask 1043456  }
  0x50   : > { %s1485_s26 = smov 4   ;;  %s1486_s27 = smov 80   ;;  %1353 = vset.pattern.permute.xlu0 %v1509_v4  ;;  %v244_v6 = vld [vmem:[%s1913_s2] sm:$0x7]  ;;  %v1717_v9 = vand.u32 127, %v316_v5  ;;  %v323_v10 = vshrl.u32 %v316_v5, 7 }
  0x51   : > { %s1487_s28 = smov 77   ;;  %s1488_s29 = smov 125   ;;  %1256 = vmatprep.mubr.msk.f32.mxu0 %vm1069_vm0, %v1068_v3  ;;  %v305_v15 = vld [vmem:[#allocation6 + $0x37] ss:$8 sm:$0x3] }
  0x52   : > { %s1489_s18 = smov 83   ;;  %s1490_s30 = smov 45   ;;  %v1719_v12 = vsub.s32 0, %v323_v10  ;;  %v1721_v13 = vsub.s32 1, %v323_v10  ;;  %vm798_vm1 = vcmp.lt.s32.totalorder %v1717_v9, 68  ;;  %vm878_vm2 = vcmp.lt.s32.totalorder %v1717_v9, 124 }
  0x53   : > { %874 = vrot.lane.b32.xlu0 %v1646_v0, %s1483_s20  ;;  %796 = vrot.lane.b32.xlu1 %v1652_v1, %s1481_s21  ;;  %s1491_s5 = smov 3   ;;  %s1492_s6 = smov 51   ;;  %v303_v16 = vld [vmem:[#allocation6 + $0x36] ss:$8 sm:$0x3]  ;;  %vm818_vm3 = vcmp.lt.s32.totalorder %v1717_v9, 64 }
  0x54   : > { %s1493_s7 = smov 48   ;;  %s1494_s8 = smov 96   ;;  %v301_v17 = vld [vmem:[#allocation6 + $0x35] ss:$8 sm:$0x3]  ;;  %v911_v18 = vrot.slane %v305_v15, %v1719_v12  ;;  %v915_v19 = vrot.slane %v305_v15, %v1721_v13  ;;  %v898_v22 = vrot.slane %v303_v16, %v1719_v12  ;;  %v902_v23 = vrot.slane %v303_v16, %v1721_v13 }
  0x55   : > { %s1495_s10 = smov 94   ;;  %s1496_s11 = smov 126   ;;  %v297_v20 = vld [vmem:[#allocation6 + $0x33] ss:$8 sm:$0x3]  ;;  %v885_v25 = vrot.slane %v301_v17, %v1719_v12  ;;  %v889_v31 = vrot.slane %v301_v17, %v1721_v13  ;;  %vm838_vm4 = vcmp.lt.s32.totalorder %v1717_v9, 60 }
  0x56   : > { %s1497_s12 = smov 98   ;;  %s1498_s14 = smov 30   ;;  %v849_v32 = vrot.slane %v297_v20, %v1721_v13  ;;  %v845_v36 = vrot.slane %v297_v20, %v1719_v12  ;;  %v299_v37 = vld [vmem:[#allocation6 + $0x34] ss:$8 sm:$0x3]  ;;  %vm858_vm6 = vcmp.lt.s32.totalorder %v1717_v9, 4 }
  0x57   : > { %876 = vrot.lane.b32.xlu1 %v1652_v1, %s1483_s20  ;;  %816 = vrot.lane.b32.xlu0 %v1652_v1, %s1482_s24  ;;  %s1499_s15 = smov 2   ;;  %s1500_s22 = smov 34   ;;  %v293_v38 = vld [vmem:[#allocation6 + $0x31] ss:$8 sm:$0x3]  ;;  %v865_v51 = vrot.slane %v299_v37, %v1719_v12  ;;  %v869_v52 = vrot.slane %v299_v37, %v1721_v13  ;;  %vm778_vm7 = vcmp.lt.s32.totalorder %v1717_v9, 77 }
  0x58   : > { %s1501_s23 = smov 32   ;;  %s1502_s21 = smov 112   ;;  %v295_v44 = vld [vmem:[#allocation6 + $0x32] ss:$8 sm:$0x3]  ;;  %v805_v56 = vrot.slane %v293_v38, %v1719_v12  ;;  %v809_v57 = vrot.slane %v293_v38, %v1721_v13  ;;  %vm758_vm8 = vcmp.lt.s32.totalorder %v1717_v9, 80 }
  0x59   : > { %s1503_s24 = smov 111   ;;  %s1504_s20 = smov 127   ;;  %v829_v58 = vrot.slane %v295_v44, %v1721_v13  ;;  %v825_v62 = vrot.slane %v295_v44, %v1719_v12  ;;  %v291_v10 = vld [vmem:[#allocation6 + $0x30] ss:$8 sm:$0x3]  ;;  %vm738_vm9 = vcmp.lt.s32.totalorder %v1717_v9, 83 }
  0x5a   : > { %v289_v20 = vld [vmem:[#allocation6 + $0x27] ss:$8 sm:$0x3]  ;;  %v287_v38 = vld [vmem:[#allocation6 + $0x26] ss:$8 sm:$0x3] }
  0x5b   : > { %836 = vrot.lane.b32.xlu1 %v1652_v1, %s1484_s25  ;;  %834 = vrot.lane.b32.xlu0 %v1646_v0, %s1484_s25  ;;  %s1505_s25 = smov 113   ;;  %v285_v44 = vld [vmem:[#allocation6 + $0x25] ss:$8 sm:$0x3]  ;;  %vm718_vm10 = vcmp.lt.s32.totalorder %v1717_v9, 125  ;;  %vm698_vm11 = vcmp.lt.s32.totalorder %v1717_v9, 3 }
  0x5c   : > { %vm678_vm12 = vcmp.lt.s32.totalorder %v1717_v9, 45  ;;  %vm658_vm13 = vcmp.lt.s32.totalorder %v1717_v9, 48  ;;  %vm638_vm14 = vcmp.lt.s32.totalorder %v1717_v9, 51  ;;  %vm618_vm15 = vcmp.lt.s32.totalorder %v1717_v9, 94  ;;  %p238_p7 = scmp.lt.s32.totalorder %s1555_s19, 1 }
  0x5d   : > { %vm598_vm0 = vcmp.lt.s32.totalorder %v1717_v9, 96 }
  0x5e   : > { %s1932_s19 = smov (!%p238_p7, %s1555_s19), 1 }
  0x5f   : > { %856 = vrot.lane.b32.xlu1 %v1652_v1, %s1485_s26  ;;  %854 = vrot.lane.b32.xlu0 %v1646_v0, %s1485_s26  ;;  %s1506_s26 = smov 1  }
  0x63   : > { %756 = vrot.lane.b32.xlu1 %v1652_v1, %s1486_s27  ;;  %754 = vrot.lane.b32.xlu0 %v1646_v0, %s1486_s27  ;;  %s1507_s27 = smov 16  }
  0x67   : > { %776 = vrot.lane.b32.xlu1 %v1652_v1, %s1487_s28  ;;  %774 = vrot.lane.b32.xlu0 %v1646_v0, %s1487_s28  ;;  %s1508_s28 = smov 15  }
  0x6b   : > { %716 = vrot.lane.b32.xlu1 %v1652_v1, %s1488_s29  ;;  %714 = vrot.lane.b32.xlu0 %v1646_v0, %s1488_s29  ;;  %s1510_s29 = smov 17  }
  0x6f   : > { %736 = vrot.lane.b32.xlu1 %v1652_v1, %s1489_s18  ;;  %734 = vrot.lane.b32.xlu0 %v1646_v0, %s1489_s18 }
  0x73   : > { %676 = vrot.lane.b32.xlu1 %v1652_v1, %s1490_s30  ;;  %674 = vrot.lane.b32.xlu0 %v1646_v0, %s1490_s30 }
  0x77   : > { %696 = vrot.lane.b32.xlu1 %v1652_v1, %s1491_s5  ;;  %694 = vrot.lane.b32.xlu0 %v1646_v0, %s1491_s5  ;;  %s1260_s5 = sshll.u32 %s1932_s19, 3 }
  0x7b   : > { %636 = vrot.lane.b32.xlu1 %v1652_v1, %s1492_s6  ;;  %634 = vrot.lane.b32.xlu0 %v1646_v0, %s1492_s6 }
  0x7f   : > { %656 = vrot.lane.b32.xlu1 %v1652_v1, %s1493_s7  ;;  %654 = vrot.lane.b32.xlu0 %v1646_v0, %s1493_s7 }
  0x83   : > { %596 = vrot.lane.b32.xlu1 %v1652_v1, %s1494_s8  ;;  %594 = vrot.lane.b32.xlu0 %v1646_v0, %s1494_s8  ;;  %s242_s8 = scalar_lea.vmem %s1915_s4, %s1260_s5 }
  0x87   : > { %616 = vrot.lane.b32.xlu1 %v1652_v1, %s1495_s10  ;;  %614 = vrot.lane.b32.xlu0 %v1646_v0, %s1495_s10 }
  0x8b   : > { %556 = vrot.lane.b32.xlu1 %v1652_v1, %s1496_s11  ;;  %554 = vrot.lane.b32.xlu0 %v1646_v0, %s1496_s11 }
  0x8f   : > { %576 = vrot.lane.b32.xlu1 %v1652_v1, %s1497_s12  ;;  %574 = vrot.lane.b32.xlu0 %v1646_v0, %s1497_s12 }
  0x93   : > { %516 = vrot.lane.b32.xlu1 %v1652_v1, %s1498_s14  ;;  %514 = vrot.lane.b32.xlu0 %v1646_v0, %s1498_s14 }
  0x97   : > { %536 = vrot.lane.b32.xlu1 %v1652_v1, %s1499_s15  ;;  %534 = vrot.lane.b32.xlu0 %v1646_v0, %s1499_s15 }
  0x9b   : > { %476 = vrot.lane.b32.xlu1 %v1652_v1, %s1500_s22  ;;  %474 = vrot.lane.b32.xlu0 %v1646_v0, %s1500_s22 }
  0x9f   : > { %496 = vrot.lane.b32.xlu1 %v1652_v1, %s1501_s23  ;;  %494 = vrot.lane.b32.xlu0 %v1646_v0, %s1501_s23 }
  0xa3   : > { %436 = vrot.lane.b32.xlu1 %v1652_v1, %s1502_s21  ;;  %434 = vrot.lane.b32.xlu0 %v1646_v0, %s1502_s21 }
  0xa7   : > { %456 = vrot.lane.b32.xlu1 %v1652_v1, %s1503_s24  ;;  %454 = vrot.lane.b32.xlu0 %v1646_v0, %s1503_s24 }
  0xab   : > { %396 = vrot.lane.b32.xlu1 %v1652_v1, %s1504_s20  ;;  %394 = vrot.lane.b32.xlu0 %v1646_v0, %s1504_s20 }
  0xaf   : > { %416 = vrot.lane.b32.xlu1 %v1652_v1, %s1505_s25  ;;  %414 = vrot.lane.b32.xlu0 %v1646_v0, %s1505_s25 }
  0xb3   : > { %376 = vrot.lane.b32.xlu1 %v1652_v1, %s1506_s26  ;;  %374 = vrot.lane.b32.xlu0 %v1646_v0, %s1506_s26 }
  0xb7   : > { %336 = vrot.lane.b32.xlu1 %v1652_v1, %s1507_s27  ;;  %334 = vrot.lane.b32.xlu0 %v1646_v0, %s1507_s27 }
  0xbb   : > { %356 = vrot.lane.b32.xlu1 %v1652_v1, %s1508_s28  ;;  %354 = vrot.lane.b32.xlu0 %v1646_v0, %s1508_s28 }
  0xbf   : > { %314 = vrot.lane.b32.xlu1 %v1652_v1, %s1510_s29  ;;  %312 = vrot.lane.b32.xlu0 %v1646_v0, %s1510_s29 }
  0xc1   : > { %v795_v7 = vpop.permute.xlu1 %794  ;;  %v815_v8 = vpop.permute.xlu0 %814 }
  0xc3   : > { %1064 = vperm.xlu0 %1353, %v244_v6  }
  0xc5   : > { %v875_v11 = vpop.permute.xlu0 %874  ;;  %v797_v14 = vpop.permute.xlu1 %796 }
  0xc6   : > { %v1730_v21 = vsel %vm798_vm1, %v795_v7, %v797_v14  ;;  %v800_v27 = vsel %vm798_vm1, %v797_v14, %v795_v7  ;;  %vm578_vm1 = vcmp.lt.s32.totalorder %v1717_v9, 98 }
  0xc7   : > { %v905_v39 = vmul.f32 %v898_v22, %v1730_v21  ;;  %v906_v40 = vmul.f32 %v902_v23, %v800_v27  ;;  %v813_v22 = vmul.f32 %v809_v57, %v1730_v21  ;;  %v769_v21 = vrot.slane %v289_v20, %v1721_v13 }
  0xc9   : > { %v877_v24 = vpop.permute.xlu1 %876  ;;  %v817_v26 = vpop.permute.xlu0 %816 }
  0xca   : > { %v879_v28 = vsel %vm878_vm2, %v875_v11, %v877_v24  ;;  %v819_v29 = vsel %vm818_vm3, %v815_v8, %v817_v26  ;;  %v820_v30 = vsel %vm818_vm3, %v817_v26, %v815_v8  ;;  %v880_v33 = vsel %vm878_vm2, %v877_v24, %v875_v11 }
  0xcb   : > { %v918_v34 = vmul.f32 %v911_v18, %v819_v29  ;;  %v919_v35 = vmul.f32 %v915_v19, %v820_v30  ;;  %v892_v41 = vmul.f32 %v885_v25, %v879_v28  ;;  %v893_v49 = vmul.f32 %v889_v31, %v880_v33 }
  0xcc   : > { %v833_v11 = vmul.f32 %v829_v58, %v819_v29  ;;  %v812_v18 = vmul.f32 %v805_v56, %v800_v27  ;;  %v832_v19 = vmul.f32 %v825_v62, %v820_v30  ;;  %v785_v24 = vrot.slane %v291_v10, %v1719_v12  ;;  %v283_v62 = vld [vmem:[#allocation6 + $0x24] ss:$8 sm:$0x3] }
  0xcd   : > { %v837_v42 = vpop.permute.xlu1 %836  ;;  %v835_v43 = vpop.permute.xlu0 %834  ;;  %v1042_v45 = vrot.slane %v918_v34, 4  ;;  %v1043_v46 = vrot.slane %v919_v35, 4  ;;  %v1036_v61 = vrot.slane %v892_v41, 4  ;;  %v1037_v4 = vrot.slane %v893_v49, 4 }
  0xce   : > { %v1749_v47 = vsel %vm838_vm4, %v835_v43, %v837_v42  ;;  %v1753_v48 = vsel %vm838_vm4, %v837_v42, %v835_v43  ;;  %v789_v25 = vrot.slane %v291_v10, %v1721_v13  ;;  %v765_v27 = vrot.slane %v289_v20, %v1719_v12 }
  0xcf   : > { %v853_v50 = vmul.f32 %v849_v32, %v1749_v47  ;;  %v852_v53 = vmul.f32 %v845_v36, %v1753_v48  ;;  %v1061_v54 = vsel %vm981_vm5, %v906_v40, %v1043_v46  ;;  %v1060_v55 = vsel %vm981_vm5, %v905_v39, %v1042_v45 }
  0xd0   : > { %1078 = vmatprep.subr.mxu0 %v1061_v54  ;;  %v1024_v30 = vrot.slane %v812_v18, 4  ;;  %v1025_v33 = vrot.slane %v813_v22, 4  ;;  %v745_v46 = vrot.slane %v287_v38, %v1719_v12  ;;  %v749_v49 = vrot.slane %v287_v38, %v1721_v13 }
  0xd1   : > { %v857_v59 = vpop.permute.xlu1 %856  ;;  %v855_v60 = vpop.permute.xlu0 %854  ;;  %1079 = vmatpush1.msra.mxu0 %v1060_v55  ;;  %v1031_v5 = vrot.slane %v853_v50, 4  ;;  %v1030_v8 = vrot.slane %v852_v53, 4  ;;  %v725_v50 = vrot.slane %v285_v44, %v1719_v12  ;;  %v729_v54 = vrot.slane %v285_v44, %v1721_v13 }
  0xd2   : > { %v859_v63 = vsel %vm858_vm6, %v855_v60, %v857_v59  ;;  %v860_v3 = vsel %vm858_vm6, %v857_v59, %v855_v60  ;;  %v705_v10 = vrot.slane %v283_v62, %v1719_v12  ;;  %vm558_vm2 = vcmp.lt.s32.totalorder %v1717_v9, 126 }
  0xd3   : > { %v872_v6 = vmul.f32 %v865_v51, %v860_v3  ;;  %v873_v7 = vmul.f32 %v869_v52, %v859_v63  ;;  %v1057_v23 = vsel %vm981_vm5, %v833_v11, %v1031_v5  ;;  %v1056_v26 = vsel %vm981_vm5, %v832_v19, %v1030_v8 }
  0xd4   : > { %v709_v11 = vrot.slane %v283_v62, %v1721_v13  ;;  %vm538_vm3 = vcmp.lt.s32.totalorder %v1717_v9, 2  ;;  %vm518_vm4 = vcmp.lt.s32.totalorder %v1717_v9, 30  ;;  %vm498_vm6 = vcmp.lt.s32.totalorder %v1717_v9, 32 }
  0xd5   : > { %v757_v14 = vpop.permute.xlu1 %756  ;;  %v755_v15 = vpop.permute.xlu0 %754  ;;  %v1059_v16 = vsel %vm981_vm5, %v873_v7, %v1037_v4  ;;  %v1058_v17 = vsel %vm981_vm5, %v872_v6, %v1036_v61  ;;  %v281_v7 = vld [vmem:[#allocation6 + $0x23] ss:$8 sm:$0x3] }
  0xd6   : > { %1080 = vmatprep.subr.mxu0 %v1059_v16  ;;  %v759_v34 = vsel %vm758_vm8, %v755_v15, %v757_v14  ;;  %v760_v37 = vsel %vm758_vm8, %v757_v14, %v755_v15  ;;  %v685_v14 = vrot.slane %v281_v7, %v1719_v12  ;;  %v689_v18 = vrot.slane %v281_v7, %v1721_v13 }
  0xd7   : > { %1081 = vmatpush1.msra.mxu0 %v1058_v17  ;;  %v772_v43 = vmul.f32 %v765_v27, %v759_v34  ;;  %v773_v45 = vmul.f32 %v769_v21, %v760_v37  ;;  %v279_v27 = vld [vmem:[#allocation6 + $0x22] ss:$8 sm:$0x3]  ;;  %vm458_vm8 = vcmp.lt.s32.totalorder %v1717_v9, 111 }
  0xd8   : > { %1082 = vmatprep.subr.mxu0 %v1057_v23  ;;  %v665_v34 = vrot.slane %v279_v27, %v1719_v12 }
  0xd9   : > { %v777_v28 = vpop.permute.xlu1 %776  ;;  %v775_v29 = vpop.permute.xlu0 %774  ;;  %1083 = vmatpush1.msra.mxu0 %v1056_v26  ;;  %v1018_v53 = vrot.slane %v772_v43, 4  ;;  %v1019_v57 = vrot.slane %v773_v45, 4 }
  0xda   : > { %v779_v31 = vsel %vm778_vm7, %v775_v29, %v777_v28  ;;  %v780_v32 = vsel %vm778_vm7, %v777_v28, %v775_v29  ;;  %vm478_vm7 = vcmp.lt.s32.totalorder %v1717_v9, 34 }
  0xdb   : > { %v792_v35 = vmul.f32 %v785_v24, %v779_v31  ;;  %v793_v36 = vmul.f32 %v789_v25, %v780_v32  ;;  %v277_v32 = vld [vmem:[#allocation6 + $0x21] ss:$8 sm:$0x3] }
  0xdd   : > { %v717_v39 = vpop.permute.xlu1 %716  ;;  %v715_v40 = vpop.permute.xlu0 %714  ;;  %v1055_v41 = vsel %vm981_vm5, %v793_v36, %v1025_v33  ;;  %v1054_v42 = vsel %vm981_vm5, %v792_v35, %v1024_v30  ;;  %v669_v35 = vrot.slane %v279_v27, %v1721_v13  ;;  %v645_v36 = vrot.slane %v277_v32, %v1719_v12 }
  0xde   : > { %1084 = vmatprep.subr.mxu0 %v1055_v41  ;;  %v719_v58 = vsel %vm718_vm10, %v715_v40, %v717_v39  ;;  %v720_v61 = vsel %vm718_vm10, %v717_v39, %v715_v40  ;;  %v649_v40 = vrot.slane %v277_v32, %v1721_v13  ;;  %vm398_vm10 = vcmp.lt.s32.totalorder %v1717_v9, 127 }
  0xdf   : > { %1085 = vmatpush1.msra.mxu0 %v1054_v42  ;;  %v732_v6 = vmul.f32 %v725_v50, %v719_v58  ;;  %v733_v8 = vmul.f32 %v729_v54, %v720_v61  ;;  %v275_v50 = vld [vmem:[#allocation6 + $0x20] ss:$8 sm:$0x3] }
  0xe0   : > { %v625_v58 = vrot.slane %v275_v50, %v1719_v12 }
  0xe1   : > { %v737_v51 = vpop.permute.xlu1 %736  ;;  %v735_v52 = vpop.permute.xlu0 %734  ;;  %v1012_v17 = vrot.slane %v732_v6, 4  ;;  %v1013_v22 = vrot.slane %v733_v8, 4 }
  0xe2   : > { %v739_v55 = vsel %vm738_vm9, %v735_v52, %v737_v51  ;;  %v740_v56 = vsel %vm738_vm9, %v737_v51, %v735_v52  ;;  %vm438_vm9 = vcmp.lt.s32.totalorder %v1717_v9, 112 }
  0xe3   : > { %v752_v59 = vmul.f32 %v745_v46, %v739_v55  ;;  %v753_v60 = vmul.f32 %v749_v49, %v740_v56  ;;  %v273_v56 = vld [vmem:[#allocation6 + $0x17] ss:$8 sm:$0x3] }
  0xe5   : > { %v677_v63 = vpop.permute.xlu1 %676  ;;  %v675_v3 = vpop.permute.xlu0 %674  ;;  %v1053_v4 = vsel %vm981_vm5, %v753_v60, %v1019_v57  ;;  %v1052_v5 = vsel %vm981_vm5, %v752_v59, %v1018_v53  ;;  %v629_v59 = vrot.slane %v275_v50, %v1721_v13  ;;  %v605_v60 = vrot.slane %v273_v56, %v1719_v12 }
  0xe6   : > { %1086 = vmatprep.subr.mxu0 %v1053_v4  ;;  %v680_v23 = vsel %vm678_vm12, %v677_v63, %v675_v3  ;;  %v679_v26 = vsel %vm678_vm12, %v675_v3, %v677_v63  ;;  %v609_v3 = vrot.slane %v273_v56, %v1721_v13  ;;  %vm378_vm12 = vcmp.lt.s32.totalorder %v1717_v9, 1 }
  0xe7   : > { %1087 = vmatpush1.msra.mxu0 %v1052_v5  ;;  %v692_v31 = vmul.f32 %v685_v14, %v680_v23  ;;  %v693_v33 = vmul.f32 %v689_v18, %v679_v26  ;;  %v271_v14 = vld [vmem:[#allocation6 + $0x16] ss:$8 sm:$0x3] }
  0xe8   : > { %v585_v23 = vrot.slane %v271_v14, %v1719_v12 }
  0xe9   : > { %v697_v15 = vpop.permute.xlu1 %696  ;;  %v695_v16 = vpop.permute.xlu0 %694  ;;  %v1006_v39 = vrot.slane %v692_v31, 4  ;;  %v1007_v43 = vrot.slane %v693_v33, 4 }
  0xea   : > { %v699_v19 = vsel %vm698_vm11, %v695_v16, %v697_v15  ;;  %v700_v20 = vsel %vm698_vm11, %v697_v15, %v695_v16  ;;  %vm418_vm11 = vcmp.lt.s32.totalorder %v1717_v9, 113 }
  0xeb   : > { %v712_v24 = vmul.f32 %v705_v10, %v700_v20  ;;  %v713_v25 = vmul.f32 %v709_v11, %v699_v19  ;;  %v269_v20 = vld [vmem:[#allocation6 + $0x15] ss:$8 sm:$0x3] }
  0xed   : > { %v637_v28 = vpop.permute.xlu1 %636  ;;  %v635_v29 = vpop.permute.xlu0 %634  ;;  %v1051_v30 = vsel %vm981_vm5, %v713_v25, %v1013_v22  ;;  %v1050_v21 = vsel %vm981_vm5, %v712_v24, %v1012_v17  ;;  %v589_v24 = vrot.slane %v271_v14, %v1721_v13  ;;  %v565_v25 = vrot.slane %v269_v20, %v1719_v12 }
  0xee   : > { %1088 = vmatprep.subr.mxu0 %v1051_v30  ;;  %v640_v44 = vsel %vm638_vm14, %v637_v28, %v635_v29  ;;  %v639_v49 = vsel %vm638_vm14, %v635_v29, %v637_v28  ;;  %v569_v29 = vrot.slane %v269_v20, %v1721_v13  ;;  %vm358_vm14 = vcmp.lt.s32.totalorder %v1717_v9, 15 }
  0xef   : > { %1089 = vmatpush1.msra.mxu0 %v1050_v21  ;;  %v652_v55 = vmul.f32 %v645_v36, %v640_v44  ;;  %v653_v57 = vmul.f32 %v649_v40, %v639_v49  ;;  %v267_v36 = vld [vmem:[#allocation6 + $0x14] ss:$8 sm:$0x3] }
  0xf0   : > { %v545_v44 = vrot.slane %v267_v36, %v1719_v12 }
  0xf1   : > { %v657_v37 = vpop.permute.xlu1 %656  ;;  %v655_v38 = vpop.permute.xlu0 %654  ;;  %v1000_v63 = vrot.slane %v652_v55, 4  ;;  %v1001_v6 = vrot.slane %v653_v57, 4 }
  0xf2   : > { %v659_v41 = vsel %vm658_vm13, %v655_v38, %v657_v37  ;;  %v660_v42 = vsel %vm658_vm13, %v657_v37, %v655_v38  ;;  %vm338_vm13 = vcmp.lt.s32.totalorder %v1717_v9, 16 }
  0xf3   : > { %v672_v45 = vmul.f32 %v665_v34, %v660_v42  ;;  %v673_v46 = vmul.f32 %v669_v35, %v659_v41  ;;  %v265_v42 = vld [vmem:[#allocation6 + $0x13] ss:$8 sm:$0x3] }
  0xf5   : > { %v597_v51 = vpop.permute.xlu1 %596  ;;  %v595_v52 = vpop.permute.xlu0 %594  ;;  %v1049_v53 = vsel %vm981_vm5, %v673_v46, %v1007_v43  ;;  %v1048_v54 = vsel %vm981_vm5, %v672_v45, %v1006_v39  ;;  %v549_v45 = vrot.slane %v267_v36, %v1721_v13  ;;  %v525_v46 = vrot.slane %v265_v42, %v1719_v12 }
  0xf6   : > { %1090 = vmatprep.subr.mxu0 %v1049_v53  ;;  %v599_v7 = vsel %vm598_vm0, %v595_v52, %v597_v51  ;;  %v600_v11 = vsel %vm598_vm0, %v597_v51, %v595_v52  ;;  %v529_v52 = vrot.slane %v265_v42, %v1721_v13 }
  0xf7   : > { %1091 = vmatpush1.msra.mxu0 %v1048_v54  ;;  %v612_v19 = vmul.f32 %v605_v60, %v599_v7  ;;  %v613_v22 = vmul.f32 %v609_v3, %v600_v11  ;;  %v263_v60 = vld [vmem:[#allocation6 + $0x12] ss:$8 sm:$0x3] }
  0xf8   : > { %v505_v7 = vrot.slane %v263_v60, %v1719_v12 }
  0xf9   : > { %v617_v61 = vpop.permute.xlu1 %616  ;;  %v615_v62 = vpop.permute.xlu0 %614  ;;  %v977_v28 = vrot.slane %v612_v19, 4  ;;  %v978_v31 = vrot.slane %v613_v22, 4 }
  0xfa   : > { %v619_v4 = vsel %vm618_vm15, %v615_v62, %v617_v61  ;;  %v620_v5 = vsel %vm618_vm15, %v617_v61, %v615_v62  ;;  %vm318_vm15 = vcmp.lt.s32.totalorder %v1717_v9, 17 }
  0xfb   : > { %v632_v8 = vmul.f32 %v625_v58, %v619_v4  ;;  %v633_v10 = vmul.f32 %v629_v59, %v620_v5  ;;  %v261_v5 = vld [vmem:[#allocation6 + $0x11] ss:$8 sm:$0x3] }
  0xfd   : > { %v557_v15 = vpop.permute.xlu1 %556  ;;  %v555_v16 = vpop.permute.xlu0 %554  ;;  %v1047_v17 = vsel %vm981_vm5, %v633_v10, %v1001_v6  ;;  %v1046_v18 = vsel %vm981_vm5, %v632_v8, %v1000_v63  ;;  %v509_v8 = vrot.slane %v263_v60, %v1721_v13  ;;  %v485_v10 = vrot.slane %v261_v5, %v1719_v12 }
  0xfe   : > { %1092 = vmatprep.subr.mxu0 %v1047_v17  ;;  %v559_v32 = vsel %vm558_vm2, %v555_v16, %v557_v15  ;;  %v560_v35 = vsel %vm558_vm2, %v557_v15, %v555_v16  ;;  %v489_v16 = vrot.slane %v261_v5, %v1721_v13 }
  0xff   : > { %1093 = vmatpush1.msra.mxu0 %v1046_v18  ;;  %v572_v41 = vmul.f32 %v565_v25, %v559_v32  ;;  %v573_v43 = vmul.f32 %v569_v29, %v560_v35  ;;  %v259_v25 = vld [vmem:[#allocation6 + $0x10] ss:$8 sm:$0x3] }
 0x100   : > { %v465_v32 = vrot.slane %v259_v25, %v1719_v12 }
 0x101   : > { %v577_v26 = vpop.permute.xlu1 %576  ;;  %v575_v27 = vpop.permute.xlu0 %574  ;;  %v971_v51 = vrot.slane %v572_v41, 4  ;;  %v972_v55 = vrot.slane %v573_v43, 4 }
 0x102   : > { %v579_v30 = vsel %vm578_vm1, %v575_v27, %v577_v26  ;;  %v580_v21 = vsel %vm578_vm1, %v577_v26, %v575_v27 }
 0x103   : > { %v592_v33 = vmul.f32 %v585_v23, %v579_v30  ;;  %v593_v34 = vmul.f32 %v589_v24, %v580_v21  ;;  %v257_v21 = vld [vmem:[#allocation6 + $0x7] ss:$8 sm:$0x3] }
 0x104   : > { %v445_v35 = vrot.slane %v257_v21, %v1719_v12  ;;  %v449_v36 = vrot.slane %v257_v21, %v1721_v13 }
 0x105   : > { %v517_v37 = vpop.permute.xlu1 %516  ;;  %v515_v38 = vpop.permute.xlu0 %514  ;;  %v997_v39 = vsel %vm981_vm5, %v593_v34, %v978_v31  ;;  %v996_v40 = vsel %vm981_vm5, %v592_v33, %v977_v28  ;;  %v469_v33 = vrot.slane %v259_v25, %v1721_v13  ;;  %v253_v34 = vld [vmem:[#allocation6 + $0x5] ss:$8 sm:$0x3] }
 0x106   : > { %1094 = vmatprep.subr.mxu0 %v997_v39  ;;  %v520_v56 = vsel %vm518_vm4, %v517_v37, %v515_v38  ;;  %v519_v59 = vsel %vm518_vm4, %v515_v38, %v517_v37  ;;  %v409_v42 = vrot.slane %v253_v34, %v1721_v13 }
 0x107   : > { %1095 = vmatpush1.msra.mxu0 %v996_v40  ;;  %v532_v4 = vmul.f32 %v525_v46, %v520_v56  ;;  %v533_v6 = vmul.f32 %v529_v52, %v519_v59 }
 0x109   : > { %v537_v49 = vpop.permute.xlu1 %536  ;;  %v535_v50 = vpop.permute.xlu0 %534  ;;  %v965_v15 = vrot.slane %v532_v4, 4  ;;  %v966_v19 = vrot.slane %v533_v6, 4 }
 0x10a   : > { %v539_v53 = vsel %vm538_vm3, %v535_v50, %v537_v49  ;;  %v540_v54 = vsel %vm538_vm3, %v537_v49, %v535_v50  ;;  %v405_v50 = vrot.slane %v253_v34, %v1719_v12  ;;  %v245_v34 = vld [vmem:[#allocation6] ss:$8 sm:$0x3] }
 0x10b   : > { %v552_v57 = vmul.f32 %v545_v44, %v540_v54  ;;  %v553_v58 = vmul.f32 %v549_v45, %v539_v53 }
 0x10d   : > { %v477_v61 = vpop.permute.xlu1 %476  ;;  %v475_v62 = vpop.permute.xlu0 %474  ;;  %v995_v63 = vsel %vm981_vm5, %v553_v58, %v972_v55  ;;  %v994_v3 = vsel %vm981_vm5, %v552_v57, %v971_v51  ;;  %v255_v51 = vld [vmem:[#allocation6 + $0x6] ss:$8 sm:$0x3] }
 0x10e   : > { %1096 = vmatprep.subr.mxu0 %v995_v63  ;;  %v480_v20 = vsel %vm478_vm7, %v477_v61, %v475_v62  ;;  %v479_v24 = vsel %vm478_vm7, %v475_v62, %v477_v61  ;;  %v425_v61 = vrot.slane %v255_v51, %v1719_v12  ;;  %v429_v62 = vrot.slane %v255_v51, %v1721_v13 }
 0x10f   : > { %1097 = vmatpush1.msra.mxu0 %v994_v3  ;;  %v492_v30 = vmul.f32 %v485_v10, %v480_v20  ;;  %v493_v31 = vmul.f32 %v489_v16, %v479_v24 }
 0x111   : > { %v497_v11 = vpop.permute.xlu1 %496  ;;  %v495_v14 = vpop.permute.xlu0 %494  ;;  %v959_v39 = vrot.slane %v492_v30, 4  ;;  %v960_v43 = vrot.slane %v493_v31, 4 }
 0x112   : > { %v499_v17 = vsel %vm498_vm6, %v495_v14, %v497_v11  ;;  %v500_v18 = vsel %vm498_vm6, %v497_v11, %v495_v14 }
 0x113   : > { %v512_v22 = vmul.f32 %v505_v7, %v500_v18  ;;  %v513_v23 = vmul.f32 %v509_v8, %v499_v17 }
 0x115   : > { %v437_v26 = vpop.permute.xlu1 %436  ;;  %v435_v27 = vpop.permute.xlu0 %434  ;;  %v993_v28 = vsel %vm981_vm5, %v513_v23, %v966_v19  ;;  %v992_v29 = vsel %vm981_vm5, %v512_v22, %v965_v15  ;;  %v251_v15 = vld [vmem:[#allocation6 + $0x3] ss:$8 sm:$0x3] }
 0x116   : > { %1098 = vmatprep.subr.mxu0 %v993_v28  ;;  %v439_v44 = vsel %vm438_vm9, %v435_v27, %v437_v26  ;;  %v440_v49 = vsel %vm438_vm9, %v437_v26, %v435_v27  ;;  %v385_v22 = vrot.slane %v251_v15, %v1719_v12  ;;  %v389_v23 = vrot.slane %v251_v15, %v1721_v13  ;;  %v247_v27 = vld [vmem:[#allocation6 + $0x1] ss:$8 sm:$0x3] }
 0x117   : > { %1099 = vmatpush1.msra.mxu0 %v992_v29  ;;  %v452_v56 = vmul.f32 %v445_v35, %v439_v44  ;;  %v453_v59 = vmul.f32 %v449_v36, %v440_v49  ;;  %v249_v29 = vld [vmem:[#allocation6 + $0x2] ss:$8 sm:$0x3]  ;;  %v349_v35 = vrot.slane %v247_v27, %v1721_v13 }
 0x118   : > { %v369_v36 = vrot.slane %v249_v29, %v1721_v13 }
 0x119   : > { %v457_v37 = vpop.permute.xlu1 %456  ;;  %v455_v38 = vpop.permute.xlu0 %454  ;;  %v953_v5 = vrot.slane %v452_v56, 4  ;;  %v954_v8 = vrot.slane %v453_v59, 4 }
 0x11a   : > { %v459_v40 = vsel %vm458_vm8, %v455_v38, %v457_v37  ;;  %v460_v41 = vsel %vm458_vm8, %v457_v37, %v455_v38 }
 0x11b   : > { %v472_v45 = vmul.f32 %v465_v32, %v459_v40  ;;  %v473_v46 = vmul.f32 %v469_v33, %v460_v41  ;;  %v345_v33 = vrot.slane %v247_v27, %v1719_v12  ;;  %v325_v40 = vrot.slane %v245_v34, %v1719_v12 }
 0x11c   : > { %v329_v41 = vrot.slane %v245_v34, %v1721_v13 }
 0x11d   : > { %v397_v52 = vpop.permute.xlu1 %396  ;;  %v395_v53 = vpop.permute.xlu0 %394  ;;  %v991_v54 = vsel %vm981_vm5, %v473_v46, %v960_v43  ;;  %v990_v55 = vsel %vm981_vm5, %v472_v45, %v959_v39  ;;  %v307_v46 = vld [vmem:[#allocation6 + $0x40] ss:$8 sm:$0x3] }
 0x11e   : > { %v399_v57 = vsel %vm398_vm10, %v395_v53, %v397_v52  ;;  %v400_v58 = vsel %vm398_vm10, %v397_v52, %v395_v53  ;;  %1100 = vmatprep.subr.mxu0 %v991_v54 }
 0x11f   : > { %v413_v60 = vmul.f32 %v409_v42, %v400_v58  ;;  %1101 = vmatpush1.msra.mxu0 %v990_v55  ;;  %v412_v63 = vmul.f32 %v405_v50, %v399_v57  ;;  %v924_v57 = vrot.slane %v307_v46, %v1719_v12  ;;  %v928_v58 = vrot.slane %v307_v46, %v1721_v13 }
 0x121   : > { %v417_v3 = vpop.permute.xlu1 %416  ;;  %v415_v4 = vpop.permute.xlu0 %414  ;;  %v948_v10 = vrot.slane %v413_v60, 4  ;;  %v947_v16 = vrot.slane %v412_v63, 4  ;;  %v932_v13 = vmul.f32 %v928_v58, %v1753_v48 }
 0x122   : > { %v419_v6 = vsel %vm418_vm11, %v415_v4, %v417_v3  ;;  %v420_v7 = vsel %vm418_vm11, %v417_v3, %v415_v4 }
 0x123   : > { %v432_v11 = vmul.f32 %v425_v61, %v419_v6  ;;  %v433_v14 = vmul.f32 %v429_v62, %v420_v7  ;;  %v987_v26 = vsel %vm981_vm5, %v1652_v1, %v948_v10  ;;  %v986_v28 = vsel %vm981_vm5, %v1646_v0, %v947_v16 }
 0x124   : > { %v365_v1 = vrot.slane %v249_v29, %v1719_v12 }
 0x125   : > { %v377_v17 = vpop.permute.xlu1 %376  ;;  %v375_v18 = vpop.permute.xlu0 %374  ;;  %v989_v19 = vsel %vm981_vm5, %v433_v14, %v954_v8  ;;  %v988_v20 = vsel %vm981_vm5, %v432_v11, %v953_v5  ;;  %v931_v5 = vmul.f32 %v924_v57, %v1749_v47 }
 0x126   : > { %1102 = vmatprep.subr.mxu0 %v989_v19  ;;  %v379_v24 = vsel %vm378_vm12, %v375_v18, %v377_v17  ;;  %v380_v25 = vsel %vm378_vm12, %v377_v17, %v375_v18 }
 0x127   : > { %1103 = vmatpush1.msra.mxu0 %v988_v20  ;;  %v392_v31 = vmul.f32 %v385_v22, %v380_v25  ;;  %v393_v32 = vmul.f32 %v389_v23, %v379_v24 }
 0x128   : > { %1104 = vmatprep.subr.mxu0 %v987_v26 }
 0x129   : > { %v337_v30 = vpop.permute.xlu1 %336  ;;  %v335_v21 = vpop.permute.xlu0 %334  ;;  %1105 = vmatpush1.msra.mxu0 %v986_v28  ;;  %v941_v42 = vrot.slane %v392_v31, 4  ;;  %v942_v43 = vrot.slane %v393_v32, 4 }
 0x12a   : > { %v339_v0 = vsel %vm338_vm13, %v335_v21, %v337_v30  ;;  %v340_v37 = vsel %vm338_vm13, %v337_v30, %v335_v21 }
 0x12b   : > { %v352_v49 = vmul.f32 %v345_v33, %v340_v37  ;;  %v353_v50 = vmul.f32 %v349_v35, %v339_v0 }
 0x12d   : > { %v357_v38 = vpop.permute.xlu1 %356  ;;  %v355_v39 = vpop.permute.xlu0 %354  ;;  %v935_v61 = vrot.slane %v352_v49, 4  ;;  %v936_v62 = vrot.slane %v353_v50, 4 }
 0x12e   : > { %v359_v44 = vsel %vm358_vm14, %v355_v39, %v357_v38  ;;  %v360_v45 = vsel %vm358_vm14, %v357_v38, %v355_v39 }
 0x12f   : > { %v372_v51 = vmul.f32 %v365_v1, %v360_v45  ;;  %v373_v52 = vmul.f32 %v369_v36, %v359_v44 }
 0x131   : > { %v315_v53 = vpop.permute.xlu1 %314  ;;  %v313_v54 = vpop.permute.xlu0 %312  ;;  %v985_v55 = vsel %vm981_vm5, %v373_v52, %v942_v43  ;;  %v984_v56 = vsel %vm981_vm5, %v372_v51, %v941_v42 }
 0x132   : > { %v319_v59 = vsel %vm318_vm15, %v313_v54, %v315_v53  ;;  %v320_v60 = vsel %vm318_vm15, %v315_v53, %v313_v54  ;;  %1106 = vmatprep.subr.mxu0 %v985_v55 }
 0x133   : > { %v332_v63 = vmul.f32 %v325_v40, %v320_v60  ;;  %v333_v3 = vmul.f32 %v329_v41, %v319_v59  ;;  %1107 = vmatpush1.msra.mxu0 %v984_v56 }
 0x135   : > { %v983_v4 = vsel %vm981_vm5, %v333_v3, %v936_v62  ;;  %v982_v12 = vsel %vm981_vm5, %v332_v63, %v935_v61 }
 0x136   : > { %1108 = vmatprep.subr.mxu0 %v983_v4 }
 0x137   : > { %1109 = vmatpush1.msra.mxu0 %v982_v12 }
 0x138   : > { %1254 = vmatprep.subr.msk.mxu0 %vm981_vm5, %v932_v13 }
 0x139   : > { %1255 = vmatpush2.msk.msra.mxu0 %vm981_vm5, %v931_v5 }
 0x13a   : > { %1143 = vmatmul.mubr.f32.vlgmr.msra.gmra.mxu0 %v1706_v2 }
 0x13e   : > { %v1065_v9 = vpop.permute.xlu0 %1064 }
 0x1fa   : > { %v1144_v6 = vpop.f32.mrf.mxu0 }
 0x1fb   : > { %v1145_v8 = vadd.f32 %v1144_v6, %v1065_v9 }
 0x1fc   : > { %v1146_v7 = vpop.f32.mrf.mxu0 }
 0x1fd   : > { %v1147_v10 = vadd.f32 %v1146_v7, %v1065_v9 }
 0x1ff   : > { %v1151_v47 = vcombine.low %v1145_v8, %v1147_v10 }
 0x201   : > { %1153 = vst [vmem:[%s242_s8] sm:$0x77] %v1151_v47 }
 0x202 PF: > { %p15_p9 = scmp.ge.s32.totalorder %s1598_s9, 4   ;;  %s1927_s15 = smov %s1466_s16 }
 0x203   : > { %s1928_s16 = smov %s1470_s17  ;;  %s1929_s17 = smov %s1609_s13 }
 0x204   : > { %s1930_s18 = smov %s1598_s9  ;;  %17 = sbr.rel (!%p15_p9) target bundleno = 4 (0x4), region = 115 }
 0x209   :  { %1175 = vsyncpa [#allocation3], 1 }
 0x20a   :  { %1177 = vsyncpa [#allocation3 + $0x1], 1 }
 0x20b   :  { %1178 = vsyncpa [#allocation5], 1 }

</bundles_post_ra>
